<compile_context>
chip_gen: v6e
topology: v6e:2x2x1
jax: 0.10.0
libtpu: 0.0.40
codegen_flags: <defaults>
</compile_context>

<pallas_src>
import functools

import jax
import jax.numpy as jnp
from jax import lax
from jax.experimental import pallas as pl
from jax.experimental.pallas import tpu as pltpu


def _round_up(v, m):
    return ((v + m - 1) // m) * m


def _mlp_kernel(x_ref, w1_ref, b1_ref, w2_ref, b2_ref, o_ref):
    # Layer 1: (bb, in_f) @ (in_f, unit) on the MXU; narrow (bf16) inputs, f32 accumulate.
    h = jnp.dot(x_ref[...], w1_ref[...], preferred_element_type=jnp.float32)
    h = jnp.maximum(h + b1_ref[...], 0.0)  # bias + ReLU in f32 (VPU)
    # Layer 2 (unit -> 1): contract h's feature axis against the W2 row vector so the
    # result lands directly in (1, bb) lane-dense orientation (unmasked vector stores)
    # instead of an N=1 matmul producing a (bb, 1) column (masked partial stores).
    y = lax.dot_general(
        w2_ref[...], h,
        dimension_numbers=(((1,), (1,)), ((), ())),
        preferred_element_type=jnp.float32)  # (1, bb)
    o_ref[...] = (y + b2_ref[0]).astype(o_ref.dtype)


@functools.partial(jax.jit, static_argnames=("block_b", "compute_dtype"))
def feedforward_net(x, w1, b1, w2, b2, *, block_b=512, compute_dtype=jnp.bfloat16):
    """Fused forward pass of FeedForwardNet.

    x : (B, input_size)
    w1: (input_size, unit_size)   b1: (unit_size,) or (1, unit_size)
    w2: (unit_size, 1)            b2: (1,) / (1, 1) / scalar
    returns (B, 1) in x.dtype
    """
    B, in_f = x.shape
    unit = w1.shape[1]
    out_dtype = x.dtype

    # Batch tile: >=128 so the MXU M-dimension is filled and the output slab is
    # lane-dense; clamp so tiny batches are not massively over-padded.
    bb = max(128, min(block_b, _round_up(B, 128)))
    bb = _round_up(bb, 128)
    b_pad = _round_up(B, bb)
    num_tiles = b_pad // bb

    # Stream x / W1 in the narrow compute dtype; f32 accumulation happens in-kernel.
    x_c = x.astype(compute_dtype)
    if b_pad != B:
        x_c = jnp.pad(x_c, ((0, b_pad - B), (0, 0)))
    w1_c = w1.astype(compute_dtype)
    b1_r = jnp.reshape(b1, (1, unit)).astype(jnp.float32)
    w2_r = jnp.reshape(w2, (1, unit)).astype(jnp.float32)  # row vector for layer 2
    b2_s = jnp.reshape(b2, (1,)).astype(jnp.float32)       # scalar, lives in SMEM

    def _isz(a):
        return jnp.dtype(a.dtype).itemsize

    cost = pl.CostEstimate(
        flops=2 * b_pad * in_f * unit + 2 * b_pad * unit,
        transcendentals=0,
        bytes_accessed=(x_c.size * _isz(x_c) + w1_c.size * _isz(w1_c)
                        + (b1_r.size + w2_r.size + b2_s.size) * 4
                        + b_pad * jnp.dtype(out_dtype).itemsize),
    )

    out = pl.pallas_call(
        _mlp_kernel,
        out_shape=jax.ShapeDtypeStruct((1, b_pad), out_dtype),
        grid_spec=pltpu.PrefetchScalarGridSpec(
            num_scalar_prefetch=0,
            grid=(num_tiles,),  # >=2 tiles when B allows -> both v7x TensorCores busy
            in_specs=[
                pl.BlockSpec((bb, in_f), lambda i: (i, 0)),          # x tile (streamed)
                pl.BlockSpec((in_f, unit), lambda i: (0, 0)),        # W1 (VMEM resident)
                pl.BlockSpec((1, unit), lambda i: (0, 0)),           # b1
                pl.BlockSpec((1, unit), lambda i: (0, 0)),           # W2 as a row
                pl.BlockSpec(memory_space=pltpu.MemorySpace.SMEM),   # b2 scalar
            ],
            out_specs=pl.BlockSpec((1, bb), lambda i: (0, i)),       # lane-dense output slab
        ),
        compiler_params=pltpu.CompilerParams(
            dimension_semantics=("parallel",),
            # VMEM use is tiny (2x bb*256 compute-dtype x-buffers + 128 KiB W1);
            # default scoped limit is ample even at block_b=2048.
        ),
        cost_estimate=cost,
    )(x_c, w1_c, b1_r, w2_r, b2_s)

    out = jnp.reshape(out, (b_pad, 1))
    return out[:B] if b_pad != B else out


def init_params(key, input_size=256, unit_size=256, dtype=jnp.float32):
    """Deterministic init mimicking torch.nn.Linear's U(-1/sqrt(fan_in), 1/sqrt(fan_in))."""
    k1, k2, k3, k4 = jax.random.split(key, 4)
    bound1 = 1.0 / (input_size ** 0.5)
    bound2 = 1.0 / (unit_size ** 0.5)
    w1 = jax.random.uniform(k1, (input_size, unit_size), dtype, -bound1, bound1)
    b1 = jax.random.uniform(k2, (unit_size,), dtype, -bound1, bound1)
    w2 = jax.random.uniform(k3, (unit_size, 1), dtype, -bound2, bound2)
    b2 = jax.random.uniform(k4, (1,), dtype, -bound2, bound2)
    return w1, b1, w2, b2


if __name__ == "__main__":
    INPUT_SIZE = 256   # module default input_size
    UNIT_SIZE = 256    # module default unit_size (n_layers=1 -> single hidden Linear+ReLU)
    BATCH = 200        # not a multiple of the tile -> exercises padding + a 2-step grid

    key = jax.random.PRNGKey(0)
    kx, kp = jax.random.split(key)
    x = jax.random.normal(kx, (BATCH, INPUT_SIZE), jnp.float32)
    w1, b1, w2, b2 = init_params(kp, INPUT_SIZE, UNIT_SIZE)

    # High-precision pure-JAX reference.
    ref = jnp.maximum(jnp.dot(x, w1, precision=jax.lax.Precision.HIGHEST) + b1, 0.0)
    ref = jnp.dot(ref, w2, precision=jax.lax.Precision.HIGHEST) + b2

    # Fast path: bf16-streamed inputs, f32 accumulation.
    out = feedforward_net(x, w1, b1, w2, b2, block_b=128)
    out = jax.block_until_ready(out)
    assert out.shape == (BATCH, 1)
    assert jnp.allclose(out, ref, atol=3e-2, rtol=3e-2), float(jnp.max(jnp.abs(out - ref)))

    # f32-streamed path: tight tolerance sanity check of the fused kernel semantics.
    out_f32 = jax.block_until_ready(
        feedforward_net(x, w1, b1, w2, b2, block_b=128, compute_dtype=jnp.float32))
    assert jnp.allclose(out_f32, ref, atol=1e-4, rtol=1e-4), \
        float(jnp.max(jnp.abs(out_f32 - ref)))

    print("KERNEL_OK")
</pallas_src>

<mosaic_0001>
module attributes {stable_mosaic.version = 11 : i64} {
  func.func @_mlp_kernel(%arg0: i32, %arg1: memref<128x256xbf16, #tpu.memory_space<vmem>>, %arg2: memref<256x256xbf16, #tpu.memory_space<vmem>>, %arg3: memref<1x256xf32, #tpu.memory_space<vmem>>, %arg4: memref<1x256xf32, #tpu.memory_space<vmem>>, %arg5: memref<1xf32, #tpu.memory_space<smem>>, %arg6: memref<1x128xf32, #tpu.memory_space<vmem>>) attributes {dimension_semantics = [#tpu.dimension_semantics<parallel>], iteration_bounds = array<i64: 2>, scalar_prefetch = 0 : i64, scratch_operands = 0 : i64, tpu.core_type = #tpu.core_type<tc>, window_params = [{transform_indices = @transform_0, window_bounds = array<i64: 128, 256>}, {pipeline_mode = #tpu.pipeline_mode<synchronous>, transform_indices = @transform_1, window_bounds = array<i64: 256, 256>}, {pipeline_mode = #tpu.pipeline_mode<synchronous>, transform_indices = @transform_2, window_bounds = array<i64: 1, 256>}, {pipeline_mode = #tpu.pipeline_mode<synchronous>, transform_indices = @transform_3, window_bounds = array<i64: 1, 256>}, {transform_indices = @transform_4, window_bounds = array<i64: 1>}, {transform_indices = @transform_5, window_bounds = array<i64: 1, 128>}]} {
    %c0 = arith.constant 0 : index
    %c0_0 = arith.constant 0 : index
    %0 = vector.load %arg1[%c0, %c0_0] : memref<128x256xbf16, #tpu.memory_space<vmem>>, vector<128x256xbf16>
    %c0_1 = arith.constant 0 : index
    %c0_2 = arith.constant 0 : index
    %1 = vector.load %arg2[%c0_1, %c0_2] : memref<256x256xbf16, #tpu.memory_space<vmem>>, vector<256x256xbf16>
    %cst = arith.constant dense<0.000000e+00> : vector<128x256xf32>
    %2 = tpu.matmul %0, %1, %cst {dimension_numbers = #tpu.dot_dimension_numbers<[1], [0], [0], [1], [0, 0, 1, 1], [], []>} : vector<128x256xbf16>, vector<256x256xbf16>, vector<128x256xf32> -> vector<128x256xf32>
    %c0_3 = arith.constant 0 : index
    %c0_4 = arith.constant 0 : index
    %3 = vector.load %arg3[%c0_3, %c0_4] : memref<1x256xf32, #tpu.memory_space<vmem>>, vector<1x256xf32>
    %4 = vector.broadcast %3 : vector<1x256xf32> to vector<128x256xf32>
    %5 = arith.addf %2, %4 : vector<128x256xf32>
    %cst_5 = arith.constant 0.000000e+00 : f32
    %6 = vector.broadcast %cst_5 : f32 to vector<128x256xf32>
    %7 = arith.maximumf %5, %6 : vector<128x256xf32>
    %c0_6 = arith.constant 0 : index
    %c0_7 = arith.constant 0 : index
    %8 = vector.load %arg4[%c0_6, %c0_7] : memref<1x256xf32, #tpu.memory_space<vmem>>, vector<1x256xf32>
    %cst_8 = arith.constant dense<0.000000e+00> : vector<1x128xf32>
    %9 = tpu.matmul %8, %7, %cst_8 {dimension_numbers = #tpu.dot_dimension_numbers<[1], [1], [0], [0], [0, 0, 1, 0], [], []>} : vector<1x256xf32>, vector<128x256xf32>, vector<1x128xf32> -> vector<1x128xf32>
    %c0_9 = arith.constant 0 : index
    %10 = memref.load %arg5[%c0_9] : memref<1xf32, #tpu.memory_space<smem>>
    %11 = vector.broadcast %10 : f32 to vector<1x128xf32>
    %12 = arith.addf %9, %11 : vector<1x128xf32>
    %c0_10 = arith.constant 0 : index
    %c0_11 = arith.constant 0 : index
    %13 = vector.load %arg6[%c0_10, %c0_11] : memref<1x128xf32, #tpu.memory_space<vmem>>, vector<1x128xf32>
    tpu.vector_store %arg6[%c0_10, %c0_11], %12 {strides = array<i32>} : memref<1x128xf32, #tpu.memory_space<vmem>>, vector<1x128xf32>,
    return
  }
  func.func @transform_0(%arg0: i32) -> (i32, i32) {
    %c0_i32 = arith.constant 0 : i32
    %c0_i32_0 = arith.constant 0 : i32
    return %arg0, %c0_i32 : i32, i32
  }
  func.func @transform_1(%arg0: i32) -> (i32, i32) {
    %c0_i32 = arith.constant 0 : i32
    %c0_i32_0 = arith.constant 0 : i32
    %c0_i32_1 = arith.constant 0 : i32
    return %c0_i32, %c0_i32_0 : i32, i32
  }
  func.func @transform_2(%arg0: i32) -> (i32, i32) {
    %c0_i32 = arith.constant 0 : i32
    %c0_i32_0 = arith.constant 0 : i32
    %c0_i32_1 = arith.constant 0 : i32
    return %c0_i32, %c0_i32_0 : i32, i32
  }
  func.func @transform_3(%arg0: i32) -> (i32, i32) {
    %c0_i32 = arith.constant 0 : i32
    %c0_i32_0 = arith.constant 0 : i32
    %c0_i32_1 = arith.constant 0 : i32
    return %c0_i32, %c0_i32_0 : i32, i32
  }
  func.func @transform_4(%arg0: i32) -> i32 {
    %c0_i32 = arith.constant 0 : i32
    %c0_i32_0 = arith.constant 0 : i32
    return %c0_i32 : i32
  }
  func.func @transform_5(%arg0: i32) -> (i32, i32) {
    %c0_i32 = arith.constant 0 : i32
    %c0_i32_0 = arith.constant 0 : i32
    return %c0_i32, %arg0 : i32, i32
  }
}

</mosaic_0001>

<bundles_post_ra>
// kernel: feedforward_net.1
= control target key start
LH: loop header
LB: loop body
LE: loop exit
PB: predicated region body
PF: predicated region fallthrough
CT: control target
= control target key end

     0   :  { %s984_s20 = smov 0   ;;  %s1222_s0 = inlined_call_operand.vmem [shape: bf16[256,256], index: 0, kind: input, shape index: {}]   ;;  %s1223_s1 = inlined_call_operand.vmem [shape: bf16[256,256], index: 1, kind: input, shape index: {}]   ;;  %s1224_s2 = inlined_call_operand.vmem [shape: f32[1,256], index: 2, kind: input, shape index: {}]   ;;  %s1225_s3 = inlined_call_operand.vmem [shape: f32[1,256], index: 3, kind: input, shape index: {}]   ;;  %s1226_s4 = inlined_call_operand.<no memory space> [shape: f32[1], index: 4, kind: input, shape index: {}]   ;;  %s1227_s5 = inlined_call_operand.vmem [shape: f32[1,256], index: 5, kind: output, shape index: {}]  }
   0x1   :  { %10 = sst [smem:[#allocation2]] %s1226_s4 }
   0x2 LB: > { %s990_s21 = sadd.s32 4294967295, %s949_s20   ;;  %p808_p0 = scmp.ge.s32.totalorder %s949_s20, 1  ;;  %s949_s20 = sphi %s984_s20, %s16_s20  }
   0x3   : > { %p190_p1 = scmp.lt.s32.totalorder %s949_s20, 3 }
   0x5   : > { %p191_p2 = pnand %p808_p0, %p190_p1 }
   0x6   : > { %s809_s6 = sshll.u32 (!%p191_p2), %s990_s21, 4  ;;  %s673_s23 = sld [smem:[#allocation2]] (!%p191_p2) }
   0x7   : > { %194 = sbr.rel (%p191_p2) target bundleno = 596 (0x254), region = 40  ;;  %p218_p3 = scmp.lt.s32.totalorder (!%p191_p2), %s809_s6, 31 }
   0x8   : > { %p224_p4 = scmp.lt.s32.totalorder (!%p191_p2), %s990_s21, 1 }
   0xc   : > { %v871_v0 = vld [vmem:[%s1223_s1 + $0x74] ss:$8 sps:$4 sm:$0xff]   ;;  %v873_v1 = vld [vmem:[%s1223_s1 + $0x70] ss:$8 sps:$4 sm:$0xff]   ;;  %v874_v2 = vld [vmem:[%s1223_s1 + $0x64] ss:$8 sps:$4 sm:$0xff]   ;;  %v277_v48 = vlaneseq }
   0xd   : > { %527 = vmatprep.subr.bf16.mxu0 %v871_v0  ;;  %v876_v3 = vld [vmem:[%s1223_s1 + $0x60] ss:$8 sps:$4 sm:$0xff]   ;;  %v877_v4 = vld [vmem:[%s1223_s1 + $0x54] ss:$8 sps:$4 sm:$0xff]   ;;  %v879_v5 = vld [vmem:[%s1223_s1 + $0x50] ss:$8 sps:$4 sm:$0xff]  }
   0xe   : > { %528 = vmatpush1.bf16.msra.mxu0 %v873_v1  ;;  %v880_v6 = vld [vmem:[%s1223_s1 + $0x44] ss:$8 sps:$4 sm:$0xff]   ;;  %v882_v7 = vld [vmem:[%s1223_s1 + $0x40] ss:$8 sps:$4 sm:$0xff]   ;;  %v883_v8 = vld [vmem:[%s1223_s1 + $0x34] ss:$8 sps:$4 sm:$0xff]  }
   0xf   : > { %529 = vmatprep.subr.bf16.mxu0 %v874_v2  ;;  %s1229_s6 = smov (!%p218_p3, %s809_s6), 31  ;;  %v885_v9 = vld [vmem:[%s1223_s1 + $0x30] ss:$8 sps:$4 sm:$0xff]   ;;  %v886_v10 = vld [vmem:[%s1223_s1 + $0x24] ss:$8 sps:$4 sm:$0xff]   ;;  %v1112_v49 = vshrl.u32 %v277_v48, 7 }
  0x10   : > { %s862_s19 = sshll.u32 %s1229_s6, 3  ;;  %v888_v11 = vld [vmem:[%s1223_s1 + $0x20] ss:$8 sps:$4 sm:$0xff]   ;;  %v889_v12 = vld [vmem:[%s1223_s1 + $0x14] ss:$8 sps:$4 sm:$0xff]   ;;  %s1231_s21 = smov (!%p224_p4, %s990_s21), 1 }
  0x11   : > { %s1034_s25 = scalar_lea.vmem %s1222_s0, %s862_s19  ;;  %v891_v14 = vld [vmem:[%s1223_s1 + $0x10] ss:$8 sps:$4 sm:$0xff]   ;;  %v892_v15 = vld [vmem:[%s1223_s1 + $0x4] ss:$8 sps:$4 sm:$0xff]   ;;  %v894_v16 = vld [vmem:[%s1223_s1] ss:$8 sps:$4 sm:$0xff]   ;;  %s226_s26 = scalar_lea.vmem %s1227_s5, %s1231_s21 }
  0x12   : > { %530 = vmatpush1.bf16.msra.mxu0 %v876_v3  ;;  %v921_v13 = vld [vmem:[%s1034_s25 + $0x4] ss:$8 sps:$4 sm:$0xff]   ;;  %v895_v17 = vld [vmem:[%s1223_s1 + $0xf4] ss:$8 sps:$4 sm:$0xff]   ;;  %v897_v18 = vld [vmem:[%s1223_s1 + $0xf0] ss:$8 sps:$4 sm:$0xff]  }
  0x13   : > { %531 = vmatprep.subr.bf16.mxu0 %v877_v4  ;;  %559 = vmatprep.mubr.bf16.mxu0 %v921_v13  ;;  %v898_v19 = vld [vmem:[%s1223_s1 + $0xe4] ss:$8 sps:$4 sm:$0xff]   ;;  %v900_v20 = vld [vmem:[%s1223_s1 + $0xe0] ss:$8 sps:$4 sm:$0xff]   ;;  %v901_v21 = vld [vmem:[%s1223_s1 + $0xd4] ss:$8 sps:$4 sm:$0xff]  }
  0x14   : > { %v903_v22 = vld [vmem:[%s1223_s1 + $0xd0] ss:$8 sps:$4 sm:$0xff]   ;;  %v904_v23 = vld [vmem:[%s1223_s1 + $0xc4] ss:$8 sps:$4 sm:$0xff]   ;;  %v906_v24 = vld [vmem:[%s1223_s1 + $0xc0] ss:$8 sps:$4 sm:$0xff]  }
  0x15   : > { %v907_v25 = vld [vmem:[%s1223_s1 + $0xb4] ss:$8 sps:$4 sm:$0xff]   ;;  %v909_v26 = vld [vmem:[%s1223_s1 + $0xb0] ss:$8 sps:$4 sm:$0xff]   ;;  %v910_v27 = vld [vmem:[%s1223_s1 + $0xa4] ss:$8 sps:$4 sm:$0xff]  }
  0x16   : > { %532 = vmatpush1.bf16.msra.mxu0 %v879_v5  ;;  %v912_v28 = vld [vmem:[%s1223_s1 + $0xa0] ss:$8 sps:$4 sm:$0xff]   ;;  %v913_v29 = vld [vmem:[%s1223_s1 + $0x94] ss:$8 sps:$4 sm:$0xff]   ;;  %v915_v30 = vld [vmem:[%s1223_s1 + $0x90] ss:$8 sps:$4 sm:$0xff]  }
  0x17   : > { %533 = vmatprep.subr.bf16.mxu0 %v880_v6  ;;  %v916_v31 = vld [vmem:[%s1223_s1 + $0x84] ss:$8 sps:$4 sm:$0xff]   ;;  %v918_v32 = vld [vmem:[%s1223_s1 + $0x80] ss:$8 sps:$4 sm:$0xff]   ;;  %v922_v34 = vld [vmem:[%s1034_s25 + $0x14] ss:$8 sps:$4 sm:$0xff]  }
  0x18   : > { %v919_v33 = vld [vmem:[%s1034_s25] ss:$8 sps:$4 sm:$0xff]   ;;  %v924_v35 = vld [vmem:[%s1034_s25 + $0x10] ss:$8 sps:$4 sm:$0xff]   ;;  %v925_v36 = vld [vmem:[%s1034_s25 + $0x24] ss:$8 sps:$4 sm:$0xff]  }
  0x19   : > { %v927_v37 = vld [vmem:[%s1034_s25 + $0x20] ss:$8 sps:$4 sm:$0xff]   ;;  %v928_v38 = vld [vmem:[%s1034_s25 + $0x34] ss:$8 sps:$4 sm:$0xff]   ;;  %v930_v39 = vld [vmem:[%s1034_s25 + $0x30] ss:$8 sps:$4 sm:$0xff]  }
  0x1a   : > { %534 = vmatpush1.bf16.msra.mxu0 %v882_v7  ;;  %v931_v40 = vld [vmem:[%s1034_s25 + $0x44] ss:$8 sps:$4 sm:$0xff]   ;;  %v933_v41 = vld [vmem:[%s1034_s25 + $0x40] ss:$8 sps:$4 sm:$0xff]   ;;  %v934_v42 = vld [vmem:[%s1034_s25 + $0x54] ss:$8 sps:$4 sm:$0xff]  }
  0x1b   : > { %535 = vmatprep.subr.bf16.mxu0 %v883_v8  ;;  %v936_v43 = vld [vmem:[%s1034_s25 + $0x50] ss:$8 sps:$4 sm:$0xff]   ;;  %v937_v44 = vld [vmem:[%s1034_s25 + $0x64] ss:$8 sps:$4 sm:$0xff]   ;;  %v939_v45 = vld [vmem:[%s1034_s25 + $0x60] ss:$8 sps:$4 sm:$0xff]  }
  0x1c   : > { %v940_v46 = vld [vmem:[%s1034_s25 + $0x74] ss:$8 sps:$4 sm:$0xff]   ;;  %v942_v47 = vld [vmem:[%s1034_s25 + $0x70] ss:$8 sps:$4 sm:$0xff]   ;;  %v283_v50 = vsub.s32 1, %v1112_v49 }
  0x1d   : > { %v1118_v51 = vld [vmem:[%s1225_s3] sm:$0x3] }
  0x1e   : > { %536 = vmatpush1.bf16.msra.mxu0 %v885_v9  ;;  %v683_v53 = vrot.slane %v1118_v51, %v283_v50 }
  0x1f   : > { %537 = vmatprep.subr.bf16.mxu0 %v886_v10 }
  0x20   : > { %750 = vmatprep.mubr.f32.mxu1 %v683_v53 }
  0x22   : > { %538 = vmatpush1.bf16.msra.mxu0 %v888_v11 }
  0x23   : > { %539 = vmatprep.subr.bf16.mxu0 %v889_v12 }
  0x26   : > { %540 = vmatpush1.bf16.msra.mxu0 %v891_v14 }
  0x27   : > { %541 = vmatprep.subr.bf16.mxu0 %v892_v15 }
  0x2a   : > { %542 = vmatpush1.bf16.msra.mxu0 %v894_v16 }
  0x2b   : > { %543 = vmatprep.subr.bf16.mxu0 %v895_v17  ;;  %v279_v17 = vsub.s32 0, %v1112_v49 }
  0x2e   : > { %544 = vmatpush2.bf16.msra.mxu0 %v897_v18 }
  0x2f   : > { %545 = vmatprep.subr.bf16.mxu0 %v898_v19  ;;  %v275_v19 = vld [vmem:[%s1224_s2] sm:$0x3] }
  0x32   : > { %546 = vmatpush2.bf16.msra.mxu0 %v900_v20 }
  0x33   : > { %547 = vmatprep.subr.bf16.mxu0 %v901_v21  ;;  %v1159_v21 = vrot.slane %v275_v19, %v279_v17 }
  0x36   : > { %548 = vmatpush2.bf16.msra.mxu0 %v903_v22 }
  0x37   : > { %549 = vmatprep.subr.bf16.mxu0 %v904_v23  ;;  %v1161_v23 = vrot.slane %v275_v19, %v283_v50 }
  0x3a   : > { %550 = vmatpush2.bf16.msra.mxu0 %v906_v24 }
  0x3b   : > { %551 = vmatprep.subr.bf16.mxu0 %v907_v25 }
  0x3e   : > { %552 = vmatpush2.bf16.msra.mxu0 %v909_v26 }
  0x3f   : > { %553 = vmatprep.subr.bf16.mxu0 %v910_v27 }
  0x42   : > { %554 = vmatpush2.bf16.msra.mxu0 %v912_v28 }
  0x43   : > { %555 = vmatprep.subr.bf16.mxu0 %v913_v29 }
  0x46   : > { %556 = vmatpush2.bf16.msra.mxu0 %v915_v30 }
  0x47   : > { %557 = vmatprep.subr.bf16.mxu0 %v916_v31 }
  0x4a   : > { %558 = vmatpush2.bf16.msra.mxu0 %v918_v32 }
  0x4d   : > { %560 = vmatmul.mubr.bf16.vlgmr.msra.gmra.mxu0 %v919_v33 }
  0x4e   : > { %569 = vmatprep.mubr.bf16.mxu0 %v922_v34 }
  0x55   : > { %570 = vmatmul.mubr.bf16.gmra.mxu0 %v924_v35 }
  0x56   : > { %579 = vmatprep.mubr.bf16.mxu0 %v925_v36 }
  0x5d   : > { %580 = vmatmul.mubr.bf16.gmra.mxu0 %v927_v37 }
  0x5e   : > { %589 = vmatprep.mubr.bf16.mxu0 %v928_v38 }
  0x65   : > { %590 = vmatmul.mubr.bf16.gmra.mxu0 %v930_v39 }
  0x66   : > { %599 = vmatprep.mubr.bf16.mxu0 %v931_v40 }
  0x6d   : > { %600 = vmatmul.mubr.bf16.gmra.mxu0 %v933_v41 }
  0x6e   : > { %609 = vmatprep.mubr.bf16.mxu0 %v934_v42 }
  0x75   : > { %610 = vmatmul.mubr.bf16.gmra.mxu0 %v936_v43 }
  0x76   : > { %619 = vmatprep.mubr.bf16.mxu0 %v937_v44 }
  0x7d   : > { %620 = vmatmul.mubr.bf16.gmra.mxu0 %v939_v45 }
  0x7e   : > { %629 = vmatprep.mubr.bf16.mxu0 %v940_v46 }
  0x85   : > { %630 = vmatmul.mubr.bf16.gmra.mxu0 %v942_v47 }
 0x10d   : > { %v1120_v52 = vpop.f32.mrf.mxu0 }
 0x10f   : > { %v1123_v54 = vpop.f32.mrf.mxu0 }
 0x111   : > { %v1125_v55 = vpop.f32.mrf.mxu0 }
 0x113   : > { %v1127_v56 = vpop.f32.mrf.mxu0 }
 0x115   : > { %v1129_v57 = vpop.f32.mrf.mxu0 }
 0x117   : > { %v1131_v58 = vpop.f32.mrf.mxu0 }
 0x119   : > { %v1133_v59 = vpop.f32.mrf.mxu0 }
 0x11b   : > { %v1135_v60 = vpop.f32.mrf.mxu0 }
 0x11d   : > { %v1137_v61 = vpop.f32.mrf.mxu0 }
 0x11f   : > { %v1139_v62 = vpop.f32.mrf.mxu0 }
 0x121   : > { %v1141_v63 = vpop.f32.mrf.mxu0 }
 0x123   : > { %v1143_v0 = vpop.f32.mrf.mxu0 }
 0x125   : > { %v1145_v1 = vpop.f32.mrf.mxu0 }
 0x127   : > { %v1147_v2 = vpop.f32.mrf.mxu0 }
 0x129   : > { %v1149_v3 = vpop.f32.mrf.mxu0 }
 0x12b   : > { %v1151_v4 = vpop.f32.mrf.mxu0 }
 0x12d   : > { %v601_v5 = vpop.f32.mrf.mxu0 }
 0x12f   : > { %v603_v6 = vpop.f32.mrf.mxu0 }
 0x131   : > { %v605_v7 = vpop.f32.mrf.mxu0 }
 0x132   : > { %v606_v50 = vadd.f32 %v605_v7, %v1159_v21  ;;  %v594_v7 = vadd.f32 %v1147_v2, %v1161_v23  ;;  %v584_v2 = vadd.f32 %v1139_v62, %v1161_v23  ;;  %v574_v62 = vadd.f32 %v1131_v58, %v1161_v23 }
 0x133   : > { %v607_v8 = vpop.f32.mrf.mxu0  ;;  %v564_v58 = vadd.f32 %v1123_v54, %v1161_v23  ;;  %v674_v54 = vstv %s673_s23 }
 0x134   : > { %v608_v47 = vadd.f32 %v607_v8, %v1161_v23  ;;  %v596_v8 = vadd.f32 %v1149_v3, %v1159_v21  ;;  %v586_v3 = vadd.f32 %v1141_v63, %v1159_v21  ;;  %v576_v63 = vadd.f32 %v1133_v59, %v1159_v21 }
 0x135   : > { %v611_v9 = vpop.f32.mrf.mxu0  ;;  %v566_v59 = vadd.f32 %v1125_v55, %v1159_v21  ;;  %v679_v55 = vrot.slane %v1118_v51, %v279_v17 }
 0x136   : > { %v612_v45 = vadd.f32 %v611_v9, %v1159_v21  ;;  %v598_v9 = vadd.f32 %v1151_v4, %v1161_v23  ;;  %v588_v4 = vadd.f32 %v1143_v0, %v1161_v23  ;;  %v578_v0 = vadd.f32 %v1135_v60, %v1161_v23 }
 0x137   : > { %v613_v10 = vpop.f32.mrf.mxu0  ;;  %v568_v60 = vadd.f32 %v1127_v56, %v1161_v23  ;;  %v641_v56 = vmax.f32 %v564_v58, 0.0 }
 0x138   : > { %v614_v43 = vadd.f32 %v613_v10, %v1161_v23  ;;  %v660_v53 = vmax.f32 %v612_v45, 0.0  ;;  %v602_v10 = vadd.f32 %v601_v5, %v1159_v21  ;;  %v592_v5 = vadd.f32 %v1145_v1, %v1159_v21 }
 0x139   : > { %v615_v11 = vpop.f32.mrf.mxu0  ;;  %v582_v1 = vadd.f32 %v1137_v61, %v1159_v21  ;;  %v572_v61 = vadd.f32 %v1129_v57, %v1159_v21  ;;  %v562_v57 = vadd.f32 %v1120_v52, %v1159_v21 }
 0x13a   : > { %v616_v41 = vadd.f32 %v615_v11, %v1159_v21  ;;  %v661_v48 = vmax.f32 %v614_v43, 0.0  ;;  %v659_v11 = vmax.f32 %v608_v47, 0.0  ;;  %v652_v19 = vmax.f32 %v592_v5, 0.0 }
 0x13b   : > { %v617_v12 = vpop.f32.mrf.mxu0 }
 0x13c   : > { %v618_v39 = vadd.f32 %v617_v12, %v1161_v23  ;;  %v662_v46 = vmax.f32 %v616_v41, 0.0  ;;  %v604_v12 = vadd.f32 %v603_v6, %v1161_v23  ;;  %v655_v6 = vmax.f32 %v598_v9, 0.0 }
 0x13d   : > { %v621_v13 = vpop.f32.mrf.mxu0 }
 0x13e   : > { %v622_v37 = vadd.f32 %v621_v13, %v1159_v21  ;;  %v663_v44 = vmax.f32 %v618_v39, 0.0  ;;  %v658_v13 = vmax.f32 %v606_v50, 0.0 }
 0x13f   : > { %v623_v14 = vpop.f32.mrf.mxu0 }
 0x140   : > { %v624_v35 = vadd.f32 %v623_v14, %v1161_v23  ;;  %v664_v42 = vmax.f32 %v622_v37, 0.0  ;;  %v657_v14 = vmax.f32 %v604_v12, 0.0 }
 0x141   : > { %v625_v15 = vpop.f32.mrf.mxu0 }
 0x142   : > { %v626_v33 = vadd.f32 %v625_v15, %v1159_v21  ;;  %v665_v40 = vmax.f32 %v624_v35, 0.0  ;;  %v656_v15 = vmax.f32 %v602_v10, 0.0 }
 0x143   : > { %v627_v16 = vpop.f32.mrf.mxu0 }
 0x144   : > { %v628_v31 = vadd.f32 %v627_v16, %v1161_v23  ;;  %v666_v38 = vmax.f32 %v626_v33, 0.0  ;;  %v654_v16 = vmax.f32 %v596_v8, 0.0 }
 0x145   : > { %v631_v18 = vpop.f32.mrf.mxu0 }
 0x146   : > { %v632_v29 = vadd.f32 %v631_v18, %v1159_v21  ;;  %v667_v36 = vmax.f32 %v628_v31, 0.0  ;;  %v653_v18 = vmax.f32 %v594_v7, 0.0  ;;  %v642_v31 = vmax.f32 %v566_v59, 0.0 }
 0x147   : > { %v633_v20 = vpop.f32.mrf.mxu0 }
 0x148   : > { %v634_v26 = vadd.f32 %v633_v20, %v1161_v23  ;;  %v668_v34 = vmax.f32 %v632_v29, 0.0  ;;  %v651_v20 = vmax.f32 %v588_v4, 0.0  ;;  %v644_v29 = vmax.f32 %v572_v61, 0.0 }
 0x149   : > { %v635_v22 = vpop.f32.mrf.mxu0 }
 0x14a   : > { %v636_v24 = vadd.f32 %v635_v22, %v1159_v21  ;;  %v669_v32 = vmax.f32 %v634_v26, 0.0  ;;  %v650_v22 = vmax.f32 %v586_v3, 0.0  ;;  %v647_v26 = vmax.f32 %v578_v0, 0.0 }
 0x14b   : > { %v637_v25 = vpop.f32.mrf.mxu0 }
 0x14c   : > { %v638_v27 = vadd.f32 %v637_v25, %v1161_v23  ;;  %v670_v30 = vmax.f32 %v636_v24, 0.0  ;;  %v649_v24 = vmax.f32 %v584_v2, 0.0  ;;  %v648_v25 = vmax.f32 %v582_v1, 0.0 }
 0x14e   : > { %v671_v28 = vmax.f32 %v638_v27, 0.0  ;;  %v646_v27 = vmax.f32 %v576_v63, 0.0 }
 0x150   : > { %686 = vmatprep.subr.mxu1 %v671_v28  ;;  %v645_v28 = vmax.f32 %v574_v62, 0.0 }
 0x151   : > { %687 = vmatpush1.xpose.msra.mxu1 %v670_v30  ;;  %v643_v30 = vmax.f32 %v568_v60, 0.0 }
 0x152   : > { %688 = vmatprep.subr.mxu1 %v669_v32  ;;  %v640_v32 = vmax.f32 %v562_v57, 0.0 }
 0x155   : > { %689 = vmatpush1.xpose.msra.mxu1 %v668_v34 }
 0x156   : > { %690 = vmatprep.subr.mxu1 %v667_v36 }
 0x159   : > { %691 = vmatpush1.xpose.msra.mxu1 %v666_v38 }
 0x15a   : > { %692 = vmatprep.subr.mxu1 %v665_v40 }
 0x15d   : > { %693 = vmatpush1.xpose.msra.mxu1 %v664_v42 }
 0x15e   : > { %694 = vmatprep.subr.mxu1 %v663_v44 }
 0x161   : > { %695 = vmatpush1.xpose.msra.mxu1 %v662_v46 }
 0x162   : > { %696 = vmatprep.subr.mxu1 %v661_v48 }
 0x165   : > { %697 = vmatpush1.xpose.msra.mxu1 %v660_v53 }
 0x166   : > { %698 = vmatprep.subr.mxu1 %v659_v11 }
 0x169   : > { %699 = vmatpush1.xpose.msra.mxu1 %v658_v13 }
 0x16a   : > { %700 = vmatprep.subr.mxu1 %v657_v14 }
 0x16d   : > { %701 = vmatpush1.xpose.msra.mxu1 %v656_v15 }
 0x16e   : > { %702 = vmatprep.subr.mxu1 %v655_v6 }
 0x171   : > { %703 = vmatpush1.xpose.msra.mxu1 %v654_v16 }
 0x172   : > { %704 = vmatprep.subr.mxu1 %v653_v18 }
 0x175   : > { %705 = vmatpush1.xpose.msra.mxu1 %v652_v19 }
 0x176   : > { %706 = vmatprep.subr.mxu1 %v651_v20 }
 0x179   : > { %707 = vmatpush1.xpose.msra.mxu1 %v650_v22 }
 0x17a   : > { %708 = vmatprep.subr.mxu1 %v649_v24 }
 0x17d   : > { %709 = vmatpush1.xpose.msra.mxu1 %v648_v25 }
 0x17e   : > { %710 = vmatprep.subr.mxu1 %v647_v26 }
 0x181   : > { %711 = vmatpush1.xpose.msra.mxu1 %v646_v27 }
 0x182   : > { %712 = vmatprep.subr.mxu1 %v645_v28 }
 0x185   : > { %713 = vmatpush1.xpose.msra.mxu1 %v644_v29 }
 0x186   : > { %714 = vmatprep.subr.mxu1 %v643_v30 }
 0x189   : > { %715 = vmatpush1.xpose.msra.mxu1 %v642_v31 }
 0x18a   : > { %716 = vmatprep.subr.mxu1 %v641_v56 }
 0x18d   : > { %717 = vmatpush1.xpose.msra.mxu1 %v640_v32 }
 0x190   : > { %751 = vmatmul.mubr.f32.vlgmr.msra.gmra.mxu1 %v679_v55 }
 0x250   : > { %v752_v52 = vpop.f32.mrf.mxu1 }
 0x251   : > { %v753_v21 = vadd.f32 %v752_v52, %v674_v54 }
 0x252   : > { %v754_v23 = vpop.f32.mrf.mxu1 }
 0x253   : > { %756 = vst [vmem:[%s226_s26] sm:$0x1] %v753_v21 }
 0x254 PF: > { %s16_s20 = sadd.s32 1, %s949_s20  }
 0x255   : > { %p13_p5 = scmp.ge.s32.totalorder %s16_s20, 4  }
 0x257   :  { %15 = sbr.rel (!%p13_p5) target bundleno = 2 (0x2), region = 70 }

</bundles_post_ra>
